<compile_context>
chip_gen: v7x
topology: tpu7x:2x2x1
jax: 0.10.0
libtpu: 0.0.40
codegen_flags: <defaults>
</compile_context>

<pallas_src>
import functools

import numpy as np
import jax
import jax.numpy as jnp
from jax.experimental import pallas as pl
from jax.experimental.pallas import tpu as pltpu


# ----------------------------------------------------------------------------
# Shape helpers (match the PyTorch module)
# ----------------------------------------------------------------------------
def get_conv_output_dim(I, K, P, S):
    return int((I - K + 2 * P) / float(S) + 1)


def gen_32_conv_output_dim(s):
    for _ in range(3):
        s = get_conv_output_dim(s, 2, 0, 2)
    return s


# ----------------------------------------------------------------------------
# Tap-major spatial permutation (computed once, host side)
# ----------------------------------------------------------------------------
def tap_major_permutation(H, W, n_levels=3):
    """Permutation of row-major flat (H*W) spatial indices such that, at every
    2x2/stride-2 conv level, tap t=(kh*2+kw) of all patches occupies a
    contiguous row block and patch order within the block equals the next
    level's row order.  The deepest (cout x cout) level is row-major, which is
    what the fc weight permutation assumes."""
    assert H % (1 << n_levels) == 0 and W % (1 << n_levels) == 0
    h, w = H >> n_levels, W >> n_levels
    order = np.arange(h * w, dtype=np.int64).reshape(h, w)   # deepest level: row-major
    for _ in range(n_levels):
        n_coarse = h * w
        fine = np.empty((2 * h, 2 * w), dtype=np.int64)
        for a in range(2):
            for b in range(2):
                fine[a::2, b::2] = (2 * a + b) * n_coarse + order
        order = fine
        h, w = 2 * h, 2 * w
    return np.argsort(order.reshape(-1)).astype(np.int32)


# ----------------------------------------------------------------------------
# Fused Pallas kernel: 3x (2x2/s2 conv + ReLU) + fc_latents, one batch element
# ----------------------------------------------------------------------------
def _encoder_kernel(x_ref, w1_ref, b1_ref, w2_ref, b2_ref, w3_ref, b3_ref,
                    wfc_ref, bfc_ref, o_ref):
    def conv2x2_relu(src, w_ref, b_ref):
        # src: (4*Np, Cin) tap-major; w_ref: (4, Cin, Cout); b_ref: (1, Cout)
        n_out = src.shape[0] // 4
        acc = jnp.dot(src[0:n_out], w_ref[0], preferred_element_type=jnp.float32)
        for t in range(1, 4):
            acc = acc + jnp.dot(src[t * n_out:(t + 1) * n_out], w_ref[t],
                                preferred_element_type=jnp.float32)
        return jnp.maximum(acc + b_ref[...], 0.0)

    h = x_ref[...].astype(jnp.float32)          # (H*W,    Cin)
    h = conv2x2_relu(h, w1_ref, b1_ref)         # (H*W/4,  F)
    h = conv2x2_relu(h, w2_ref, b2_ref)         # (H*W/16, 2F)
    h = conv2x2_relu(h, w3_ref, b3_ref)         # (cout^2, 4F)   (relu after last conv too)

    # fc_latents: contract over (spatial, channel).  wfc_ref: (cout^2, 4F, Nz)
    n_spatial = h.shape[0]
    acc = jnp.dot(h[0:1], wfc_ref[0], preferred_element_type=jnp.float32)
    for s in range(1, n_spatial):
        acc = acc + jnp.dot(h[s:s + 1], wfc_ref[s],
                            preferred_element_type=jnp.float32)
    o_ref[...] = (acc + bfc_ref[...]).astype(o_ref.dtype)


# ----------------------------------------------------------------------------
# One-time weight re-layout (so the kernel needs no in-kernel transposes)
# ----------------------------------------------------------------------------
def prep_kernel_params(params, cout, n_filters):
    def conv_taps(w):
        # PyTorch Conv2d weight (Cout, Cin, 2, 2) -> (4, Cin, Cout), tap = kh*2+kw
        c_out, c_in = w.shape[0], w.shape[1]
        return jnp.transpose(w, (2, 3, 1, 0)).reshape(4, c_in, c_out)

    F4 = 4 * n_filters
    n_out = params["fc_w"].shape[0]
    # fc_latents.weight (Nz, 4F*cout^2); PyTorch flatten index = c*cout^2 + spatial.
    # Re-layout to (cout^2, 4F, Nz) so conv-output row r (channels in lanes)
    # multiplies wfc[r] directly.
    wfc = params["fc_w"].reshape(n_out, F4, cout * cout)
    wfc = jnp.transpose(wfc, (2, 1, 0))
    return {
        "w1": conv_taps(params["conv1_w"]), "b1": params["conv1_b"].reshape(1, -1),
        "w2": conv_taps(params["conv2_w"]), "b2": params["conv2_b"].reshape(1, -1),
        "w3": conv_taps(params["conv3_w"]), "b3": params["conv3_b"].reshape(1, -1),
        "wfc": wfc, "bfc": params["fc_b"].reshape(1, -1),
    }


# ----------------------------------------------------------------------------
# Forward pass (single fused pallas_call)
# ----------------------------------------------------------------------------
@functools.partial(jax.jit,
                   static_argnames=("z_dim", "n_mixtures", "n_filters", "cout"))
def image_encoder_forward(kparams, image, perm, *, z_dim, n_mixtures,
                          n_filters, cout):
    if n_mixtures != 1:
        # TODO(synk): fc_logits head for n_mixtures > 1 not implemented (module default is 1).
        raise NotImplementedError("n_mixtures > 1 not supported")

    B, Cin, H, W = image.shape
    F = n_filters
    Nz = 2 * z_dim * n_mixtures

    # NCHW -> (B, H*W, Cin) with spatial positions in tap-major order.
    # This is the only wrapper-side layout pass; all other layout work was
    # baked into the weights at prep time.
    x = jnp.transpose(image, (0, 2, 3, 1)).reshape(B, H * W, Cin)
    x = jnp.take(x, perm, axis=1)

    z_params = pl.pallas_call(
        _encoder_kernel,
        out_shape=jax.ShapeDtypeStruct((B, 1, Nz), jnp.float32),
        grid=(B,),
        in_specs=[
            pl.BlockSpec((None, H * W, Cin), lambda b: (b, 0, 0)),      # image (per-batch block)
            pl.BlockSpec((4, Cin, F), lambda b: (0, 0, 0)),             # conv1 taps
            pl.BlockSpec((1, F), lambda b: (0, 0)),                     # conv1 bias
            pl.BlockSpec((4, F, 2 * F), lambda b: (0, 0, 0)),           # conv2 taps
            pl.BlockSpec((1, 2 * F), lambda b: (0, 0)),                 # conv2 bias
            pl.BlockSpec((4, 2 * F, 4 * F), lambda b: (0, 0, 0)),       # conv3 taps
            pl.BlockSpec((1, 4 * F), lambda b: (0, 0)),                 # conv3 bias
            pl.BlockSpec((cout * cout, 4 * F, Nz), lambda b: (0, 0, 0)),  # fc weight
            pl.BlockSpec((1, Nz), lambda b: (0, 0)),                    # fc bias
        ],
        out_specs=pl.BlockSpec((None, 1, Nz), lambda b: (b, 0, 0)),
        compiler_params=pltpu.CompilerParams(
            dimension_semantics=("parallel",)),
    )(x, kparams["w1"], kparams["b1"], kparams["w2"], kparams["b2"],
      kparams["w3"], kparams["b3"], kparams["wfc"], kparams["bfc"])

    z_params = z_params.reshape(B, Nz)
    z_mu, z_logvar = jnp.split(z_params, 2, axis=1)
    z_mu = z_mu.reshape(B, n_mixtures, z_dim)
    z_logvar = z_logvar.reshape(B, n_mixtures, z_dim)
    logits = None
    return z_mu, z_logvar, logits


# ----------------------------------------------------------------------------
# Parameter init (PyTorch-style layouts and uniform bounds)
# ----------------------------------------------------------------------------
def init_params(key, input_channels, image_size, z_dim, n_mixtures, n_filters):
    cout = gen_32_conv_output_dim(image_size)
    F1, F2, F4 = n_filters, 2 * n_filters, 4 * n_filters
    keys = jax.random.split(key, 8)

    def u(k, shape, fan_in):
        bound = 1.0 / float(np.sqrt(fan_in))
        return jax.random.uniform(k, shape, jnp.float32, -bound, bound)

    return {
        "conv1_w": u(keys[0], (F1, input_channels, 2, 2), input_channels * 4),
        "conv1_b": u(keys[1], (F1,), input_channels * 4),
        "conv2_w": u(keys[2], (F2, F1, 2, 2), F1 * 4),
        "conv2_b": u(keys[3], (F2,), F1 * 4),
        "conv3_w": u(keys[4], (F4, F2, 2, 2), F2 * 4),
        "conv3_b": u(keys[5], (F4,), F2 * 4),
        "fc_w": u(keys[6], (2 * z_dim * n_mixtures, F4 * cout * cout),
                  F4 * cout * cout),
        "fc_b": u(keys[7], (2 * z_dim * n_mixtures,), F4 * cout * cout),
    }


# ----------------------------------------------------------------------------
# Independent pure-JAX reference (XLA convs on PyTorch-layout weights)
# ----------------------------------------------------------------------------
def image_encoder_reference(params, image, *, z_dim, n_mixtures, n_filters, cout):
    B = image.shape[0]
    dn = ("NCHW", "OIHW", "NCHW")

    def conv(x, w, b):
        y = jax.lax.conv_general_dilated(
            x, w, window_strides=(2, 2), padding="VALID",
            dimension_numbers=dn, precision=jax.lax.Precision.HIGHEST)
        return y + b.reshape(1, -1, 1, 1)

    out = jax.nn.relu(conv(image, params["conv1_w"], params["conv1_b"]))
    out = jax.nn.relu(conv(out, params["conv2_w"], params["conv2_b"]))
    out = conv(out, params["conv3_w"], params["conv3_b"])
    out = jax.nn.relu(out)                                    # relu after conv stack
    out = out.reshape(B, 4 * n_filters * cout * cout)
    z_params = jnp.dot(out, params["fc_w"].T,
                       precision=jax.lax.Precision.HIGHEST) + params["fc_b"]
    z_mu, z_logvar = jnp.split(z_params, 2, axis=1)
    return (z_mu.reshape(B, n_mixtures, z_dim),
            z_logvar.reshape(B, n_mixtures, z_dim), None)


# ----------------------------------------------------------------------------
if __name__ == "__main__":
    input_channels = 4
    image_size = 16            # gen_32_conv_output_dim(16) == 2
    z_dim = 32
    n_mixtures = 1
    n_filters = 8
    batch = 2

    cout = gen_32_conv_output_dim(image_size)

    key = jax.random.PRNGKey(0)
    kp, kx = jax.random.split(key)
    params = init_params(kp, input_channels, image_size, z_dim, n_mixtures,
                         n_filters)
    image = jax.random.normal(
        kx, (batch, input_channels, image_size, image_size), jnp.float32)

    kparams = prep_kernel_params(params, cout, n_filters)
    perm = jnp.asarray(tap_major_permutation(image_size, image_size, 3))

    z_mu, z_logvar, logits = image_encoder_forward(
        kparams, image, perm, z_dim=z_dim, n_mixtures=n_mixtures,
        n_filters=n_filters, cout=cout)
    z_mu = jax.block_until_ready(z_mu)
    z_logvar = jax.block_until_ready(z_logvar)

    r_mu, r_logvar, r_logits = image_encoder_reference(
        params, image, z_dim=z_dim, n_mixtures=n_mixtures,
        n_filters=n_filters, cout=cout)

    assert z_mu.shape == (batch, n_mixtures, z_dim)
    assert z_logvar.shape == (batch, n_mixtures, z_dim)
    assert logits is None and r_logits is None
    assert jnp.allclose(z_mu, r_mu, atol=1e-3, rtol=1e-3), \
        float(jnp.max(jnp.abs(z_mu - r_mu)))
    assert jnp.allclose(z_logvar, r_logvar, atol=1e-3, rtol=1e-3), \
        float(jnp.max(jnp.abs(z_logvar - r_logvar)))
    print("KERNEL_OK")
</pallas_src>

<mosaic_0001>
module attributes {stable_mosaic.version = 11 : i64} {
  func.func @_encoder_kernel(%arg0: i32, %arg1: memref<1x256x4xf32, #tpu.memory_space<vmem>>, %arg2: memref<4x4x8xf32, #tpu.memory_space<vmem>>, %arg3: memref<1x8xf32, #tpu.memory_space<vmem>>, %arg4: memref<4x8x16xf32, #tpu.memory_space<vmem>>, %arg5: memref<1x16xf32, #tpu.memory_space<vmem>>, %arg6: memref<4x16x32xf32, #tpu.memory_space<vmem>>, %arg7: memref<1x32xf32, #tpu.memory_space<vmem>>, %arg8: memref<4x32x64xf32, #tpu.memory_space<vmem>>, %arg9: memref<1x64xf32, #tpu.memory_space<vmem>>, %arg10: memref<1x1x64xf32, #tpu.memory_space<vmem>>) attributes {dimension_semantics = [#tpu.dimension_semantics<parallel>], iteration_bounds = array<i64: 2>, scalar_prefetch = 0 : i64, scratch_operands = 0 : i64, tpu.core_type = #tpu.core_type<tc>, window_params = [{transform_indices = @transform_0, window_bounds = array<i64: 1, 256, 4>}, {pipeline_mode = #tpu.pipeline_mode<synchronous>, transform_indices = @transform_1, window_bounds = array<i64: 4, 4, 8>}, {pipeline_mode = #tpu.pipeline_mode<synchronous>, transform_indices = @transform_2, window_bounds = array<i64: 1, 8>}, {pipeline_mode = #tpu.pipeline_mode<synchronous>, transform_indices = @transform_3, window_bounds = array<i64: 4, 8, 16>}, {pipeline_mode = #tpu.pipeline_mode<synchronous>, transform_indices = @transform_4, window_bounds = array<i64: 1, 16>}, {pipeline_mode = #tpu.pipeline_mode<synchronous>, transform_indices = @transform_5, window_bounds = array<i64: 4, 16, 32>}, {pipeline_mode = #tpu.pipeline_mode<synchronous>, transform_indices = @transform_6, window_bounds = array<i64: 1, 32>}, {pipeline_mode = #tpu.pipeline_mode<synchronous>, transform_indices = @transform_7, window_bounds = array<i64: 4, 32, 64>}, {pipeline_mode = #tpu.pipeline_mode<synchronous>, transform_indices = @transform_8, window_bounds = array<i64: 1, 64>}, {transform_indices = @transform_9, window_bounds = array<i64: 1, 1, 64>}]} {
    %c0 = arith.constant 0 : index
    %c0_0 = arith.constant 0 : index
    %c0_1 = arith.constant 0 : index
    %0 = vector.load %arg1[%c0, %c0_0, %c0_1] : memref<1x256x4xf32, #tpu.memory_space<vmem>>, vector<1x256x4xf32>
    %1 = vector.shape_cast %0 : vector<1x256x4xf32> to vector<256x4xf32>
    %2 = vector.extract_strided_slice %1 {offsets = [0, 0], sizes = [64, 4], strides = [1, 1]} : vector<256x4xf32> to vector<64x4xf32>
    %c0_2 = arith.constant 0 : index
    %c0_3 = arith.constant 0 : index
    %c0_4 = arith.constant 0 : index
    %3 = vector.load %arg2[%c0_2, %c0_3, %c0_4] : memref<4x4x8xf32, #tpu.memory_space<vmem>>, vector<1x4x8xf32>
    %4 = vector.shape_cast %3 : vector<1x4x8xf32> to vector<4x8xf32>
    %cst = arith.constant dense<0.000000e+00> : vector<64x8xf32>
    %5 = tpu.matmul %2, %4, %cst {dimension_numbers = #tpu.dot_dimension_numbers<[1], [0], [0], [1], [0, 0, 1, 1], [], []>} : vector<64x4xf32>, vector<4x8xf32>, vector<64x8xf32> -> vector<64x8xf32>
    %6 = vector.extract_strided_slice %1 {offsets = [64, 0], sizes = [64, 4], strides = [1, 1]} : vector<256x4xf32> to vector<64x4xf32>
    %c1 = arith.constant 1 : index
    %c0_5 = arith.constant 0 : index
    %c0_6 = arith.constant 0 : index
    %7 = vector.load %arg2[%c1, %c0_5, %c0_6] : memref<4x4x8xf32, #tpu.memory_space<vmem>>, vector<1x4x8xf32>
    %8 = vector.shape_cast %7 : vector<1x4x8xf32> to vector<4x8xf32>
    %cst_7 = arith.constant dense<0.000000e+00> : vector<64x8xf32>
    %9 = tpu.matmul %6, %8, %cst_7 {dimension_numbers = #tpu.dot_dimension_numbers<[1], [0], [0], [1], [0, 0, 1, 1], [], []>} : vector<64x4xf32>, vector<4x8xf32>, vector<64x8xf32> -> vector<64x8xf32>
    %10 = arith.addf %5, %9 : vector<64x8xf32>
    %11 = vector.extract_strided_slice %1 {offsets = [128, 0], sizes = [64, 4], strides = [1, 1]} : vector<256x4xf32> to vector<64x4xf32>
    %c2 = arith.constant 2 : index
    %c0_8 = arith.constant 0 : index
    %c0_9 = arith.constant 0 : index
    %12 = vector.load %arg2[%c2, %c0_8, %c0_9] : memref<4x4x8xf32, #tpu.memory_space<vmem>>, vector<1x4x8xf32>
    %13 = vector.shape_cast %12 : vector<1x4x8xf32> to vector<4x8xf32>
    %cst_10 = arith.constant dense<0.000000e+00> : vector<64x8xf32>
    %14 = tpu.matmul %11, %13, %cst_10 {dimension_numbers = #tpu.dot_dimension_numbers<[1], [0], [0], [1], [0, 0, 1, 1], [], []>} : vector<64x4xf32>, vector<4x8xf32>, vector<64x8xf32> -> vector<64x8xf32>
    %15 = arith.addf %10, %14 : vector<64x8xf32>
    %16 = vector.extract_strided_slice %1 {offsets = [192, 0], sizes = [64, 4], strides = [1, 1]} : vector<256x4xf32> to vector<64x4xf32>
    %c3 = arith.constant 3 : index
    %c0_11 = arith.constant 0 : index
    %c0_12 = arith.constant 0 : index
    %17 = vector.load %arg2[%c3, %c0_11, %c0_12] : memref<4x4x8xf32, #tpu.memory_space<vmem>>, vector<1x4x8xf32>
    %18 = vector.shape_cast %17 : vector<1x4x8xf32> to vector<4x8xf32>
    %cst_13 = arith.constant dense<0.000000e+00> : vector<64x8xf32>
    %19 = tpu.matmul %16, %18, %cst_13 {dimension_numbers = #tpu.dot_dimension_numbers<[1], [0], [0], [1], [0, 0, 1, 1], [], []>} : vector<64x4xf32>, vector<4x8xf32>, vector<64x8xf32> -> vector<64x8xf32>
    %20 = arith.addf %15, %19 : vector<64x8xf32>
    %c0_14 = arith.constant 0 : index
    %c0_15 = arith.constant 0 : index
    %21 = vector.load %arg3[%c0_14, %c0_15] : memref<1x8xf32, #tpu.memory_space<vmem>>, vector<1x8xf32>
    %22 = vector.broadcast %21 : vector<1x8xf32> to vector<64x8xf32>
    %23 = arith.addf %20, %22 : vector<64x8xf32>
    %cst_16 = arith.constant 0.000000e+00 : f32
    %24 = vector.broadcast %cst_16 : f32 to vector<64x8xf32>
    %25 = arith.maximumf %23, %24 : vector<64x8xf32>
    %26 = vector.extract_strided_slice %25 {offsets = [0, 0], sizes = [16, 8], strides = [1, 1]} : vector<64x8xf32> to vector<16x8xf32>
    %c0_17 = arith.constant 0 : index
    %c0_18 = arith.constant 0 : index
    %c0_19 = arith.constant 0 : index
    %27 = vector.load %arg4[%c0_17, %c0_18, %c0_19] : memref<4x8x16xf32, #tpu.memory_space<vmem>>, vector<1x8x16xf32>
    %28 = vector.shape_cast %27 : vector<1x8x16xf32> to vector<8x16xf32>
    %cst_20 = arith.constant dense<0.000000e+00> : vector<16x16xf32>
    %29 = tpu.matmul %26, %28, %cst_20 {dimension_numbers = #tpu.dot_dimension_numbers<[1], [0], [0], [1], [0, 0, 1, 1], [], []>} : vector<16x8xf32>, vector<8x16xf32>, vector<16x16xf32> -> vector<16x16xf32>
    %30 = vector.extract_strided_slice %25 {offsets = [16, 0], sizes = [16, 8], strides = [1, 1]} : vector<64x8xf32> to vector<16x8xf32>
    %c1_21 = arith.constant 1 : index
    %c0_22 = arith.constant 0 : index
    %c0_23 = arith.constant 0 : index
    %31 = vector.load %arg4[%c1_21, %c0_22, %c0_23] : memref<4x8x16xf32, #tpu.memory_space<vmem>>, vector<1x8x16xf32>
    %32 = vector.shape_cast %31 : vector<1x8x16xf32> to vector<8x16xf32>
    %cst_24 = arith.constant dense<0.000000e+00> : vector<16x16xf32>
    %33 = tpu.matmul %30, %32, %cst_24 {dimension_numbers = #tpu.dot_dimension_numbers<[1], [0], [0], [1], [0, 0, 1, 1], [], []>} : vector<16x8xf32>, vector<8x16xf32>, vector<16x16xf32> -> vector<16x16xf32>
    %34 = arith.addf %29, %33 : vector<16x16xf32>
    %35 = vector.extract_strided_slice %25 {offsets = [32, 0], sizes = [16, 8], strides = [1, 1]} : vector<64x8xf32> to vector<16x8xf32>
    %c2_25 = arith.constant 2 : index
    %c0_26 = arith.constant 0 : index
    %c0_27 = arith.constant 0 : index
    %36 = vector.load %arg4[%c2_25, %c0_26, %c0_27] : memref<4x8x16xf32, #tpu.memory_space<vmem>>, vector<1x8x16xf32>
    %37 = vector.shape_cast %36 : vector<1x8x16xf32> to vector<8x16xf32>
    %cst_28 = arith.constant dense<0.000000e+00> : vector<16x16xf32>
    %38 = tpu.matmul %35, %37, %cst_28 {dimension_numbers = #tpu.dot_dimension_numbers<[1], [0], [0], [1], [0, 0, 1, 1], [], []>} : vector<16x8xf32>, vector<8x16xf32>, vector<16x16xf32> -> vector<16x16xf32>
    %39 = arith.addf %34, %38 : vector<16x16xf32>
    %40 = vector.extract_strided_slice %25 {offsets = [48, 0], sizes = [16, 8], strides = [1, 1]} : vector<64x8xf32> to vector<16x8xf32>
    %c3_29 = arith.constant 3 : index
    %c0_30 = arith.constant 0 : index
    %c0_31 = arith.constant 0 : index
    %41 = vector.load %arg4[%c3_29, %c0_30, %c0_31] : memref<4x8x16xf32, #tpu.memory_space<vmem>>, vector<1x8x16xf32>
    %42 = vector.shape_cast %41 : vector<1x8x16xf32> to vector<8x16xf32>
    %cst_32 = arith.constant dense<0.000000e+00> : vector<16x16xf32>
    %43 = tpu.matmul %40, %42, %cst_32 {dimension_numbers = #tpu.dot_dimension_numbers<[1], [0], [0], [1], [0, 0, 1, 1], [], []>} : vector<16x8xf32>, vector<8x16xf32>, vector<16x16xf32> -> vector<16x16xf32>
    %44 = arith.addf %39, %43 : vector<16x16xf32>
    %c0_33 = arith.constant 0 : index
    %c0_34 = arith.constant 0 : index
    %45 = vector.load %arg5[%c0_33, %c0_34] : memref<1x16xf32, #tpu.memory_space<vmem>>, vector<1x16xf32>
    %46 = vector.broadcast %45 : vector<1x16xf32> to vector<16x16xf32>
    %47 = arith.addf %44, %46 : vector<16x16xf32>
    %cst_35 = arith.constant 0.000000e+00 : f32
    %48 = vector.broadcast %cst_35 : f32 to vector<16x16xf32>
    %49 = arith.maximumf %47, %48 : vector<16x16xf32>
    %50 = vector.extract_strided_slice %49 {offsets = [0, 0], sizes = [4, 16], strides = [1, 1]} : vector<16x16xf32> to vector<4x16xf32>
    %c0_36 = arith.constant 0 : index
    %c0_37 = arith.constant 0 : index
    %c0_38 = arith.constant 0 : index
    %51 = vector.load %arg6[%c0_36, %c0_37, %c0_38] : memref<4x16x32xf32, #tpu.memory_space<vmem>>, vector<1x16x32xf32>
    %52 = vector.shape_cast %51 : vector<1x16x32xf32> to vector<16x32xf32>
    %cst_39 = arith.constant dense<0.000000e+00> : vector<4x32xf32>
    %53 = tpu.matmul %50, %52, %cst_39 {dimension_numbers = #tpu.dot_dimension_numbers<[1], [0], [0], [1], [0, 0, 1, 1], [], []>} : vector<4x16xf32>, vector<16x32xf32>, vector<4x32xf32> -> vector<4x32xf32>
    %54 = vector.extract_strided_slice %49 {offsets = [4, 0], sizes = [4, 16], strides = [1, 1]} : vector<16x16xf32> to vector<4x16xf32>
    %c1_40 = arith.constant 1 : index
    %c0_41 = arith.constant 0 : index
    %c0_42 = arith.constant 0 : index
    %55 = vector.load %arg6[%c1_40, %c0_41, %c0_42] : memref<4x16x32xf32, #tpu.memory_space<vmem>>, vector<1x16x32xf32>
    %56 = vector.shape_cast %55 : vector<1x16x32xf32> to vector<16x32xf32>
    %cst_43 = arith.constant dense<0.000000e+00> : vector<4x32xf32>
    %57 = tpu.matmul %54, %56, %cst_43 {dimension_numbers = #tpu.dot_dimension_numbers<[1], [0], [0], [1], [0, 0, 1, 1], [], []>} : vector<4x16xf32>, vector<16x32xf32>, vector<4x32xf32> -> vector<4x32xf32>
    %58 = arith.addf %53, %57 : vector<4x32xf32>
    %59 = vector.extract_strided_slice %49 {offsets = [8, 0], sizes = [4, 16], strides = [1, 1]} : vector<16x16xf32> to vector<4x16xf32>
    %c2_44 = arith.constant 2 : index
    %c0_45 = arith.constant 0 : index
    %c0_46 = arith.constant 0 : index
    %60 = vector.load %arg6[%c2_44, %c0_45, %c0_46] : memref<4x16x32xf32, #tpu.memory_space<vmem>>, vector<1x16x32xf32>
    %61 = vector.shape_cast %60 : vector<1x16x32xf32> to vector<16x32xf32>
    %cst_47 = arith.constant dense<0.000000e+00> : vector<4x32xf32>
    %62 = tpu.matmul %59, %61, %cst_47 {dimension_numbers = #tpu.dot_dimension_numbers<[1], [0], [0], [1], [0, 0, 1, 1], [], []>} : vector<4x16xf32>, vector<16x32xf32>, vector<4x32xf32> -> vector<4x32xf32>
    %63 = arith.addf %58, %62 : vector<4x32xf32>
    %64 = vector.extract_strided_slice %49 {offsets = [12, 0], sizes = [4, 16], strides = [1, 1]} : vector<16x16xf32> to vector<4x16xf32>
    %c3_48 = arith.constant 3 : index
    %c0_49 = arith.constant 0 : index
    %c0_50 = arith.constant 0 : index
    %65 = vector.load %arg6[%c3_48, %c0_49, %c0_50] : memref<4x16x32xf32, #tpu.memory_space<vmem>>, vector<1x16x32xf32>
    %66 = vector.shape_cast %65 : vector<1x16x32xf32> to vector<16x32xf32>
    %cst_51 = arith.constant dense<0.000000e+00> : vector<4x32xf32>
    %67 = tpu.matmul %64, %66, %cst_51 {dimension_numbers = #tpu.dot_dimension_numbers<[1], [0], [0], [1], [0, 0, 1, 1], [], []>} : vector<4x16xf32>, vector<16x32xf32>, vector<4x32xf32> -> vector<4x32xf32>
    %68 = arith.addf %63, %67 : vector<4x32xf32>
    %c0_52 = arith.constant 0 : index
    %c0_53 = arith.constant 0 : index
    %69 = vector.load %arg7[%c0_52, %c0_53] : memref<1x32xf32, #tpu.memory_space<vmem>>, vector<1x32xf32>
    %70 = vector.broadcast %69 : vector<1x32xf32> to vector<4x32xf32>
    %71 = arith.addf %68, %70 : vector<4x32xf32>
    %cst_54 = arith.constant 0.000000e+00 : f32
    %72 = vector.broadcast %cst_54 : f32 to vector<4x32xf32>
    %73 = arith.maximumf %71, %72 : vector<4x32xf32>
    %74 = vector.extract_strided_slice %73 {offsets = [0, 0], sizes = [1, 32], strides = [1, 1]} : vector<4x32xf32> to vector<1x32xf32>
    %c0_55 = arith.constant 0 : index
    %c0_56 = arith.constant 0 : index
    %c0_57 = arith.constant 0 : index
    %75 = vector.load %arg8[%c0_55, %c0_56, %c0_57] : memref<4x32x64xf32, #tpu.memory_space<vmem>>, vector<1x32x64xf32>
    %76 = vector.shape_cast %75 : vector<1x32x64xf32> to vector<32x64xf32>
    %cst_58 = arith.constant dense<0.000000e+00> : vector<1x64xf32>
    %77 = tpu.matmul %74, %76, %cst_58 {dimension_numbers = #tpu.dot_dimension_numbers<[1], [0], [0], [1], [0, 0, 1, 1], [], []>} : vector<1x32xf32>, vector<32x64xf32>, vector<1x64xf32> -> vector<1x64xf32>
    %78 = vector.extract_strided_slice %73 {offsets = [1, 0], sizes = [1, 32], strides = [1, 1]} : vector<4x32xf32> to vector<1x32xf32>
    %c1_59 = arith.constant 1 : index
    %c0_60 = arith.constant 0 : index
    %c0_61 = arith.constant 0 : index
    %79 = vector.load %arg8[%c1_59, %c0_60, %c0_61] : memref<4x32x64xf32, #tpu.memory_space<vmem>>, vector<1x32x64xf32>
    %80 = vector.shape_cast %79 : vector<1x32x64xf32> to vector<32x64xf32>
    %cst_62 = arith.constant dense<0.000000e+00> : vector<1x64xf32>
    %81 = tpu.matmul %78, %80, %cst_62 {dimension_numbers = #tpu.dot_dimension_numbers<[1], [0], [0], [1], [0, 0, 1, 1], [], []>} : vector<1x32xf32>, vector<32x64xf32>, vector<1x64xf32> -> vector<1x64xf32>
    %82 = arith.addf %77, %81 : vector<1x64xf32>
    %83 = vector.extract_strided_slice %73 {offsets = [2, 0], sizes = [1, 32], strides = [1, 1]} : vector<4x32xf32> to vector<1x32xf32>
    %c2_63 = arith.constant 2 : index
    %c0_64 = arith.constant 0 : index
    %c0_65 = arith.constant 0 : index
    %84 = vector.load %arg8[%c2_63, %c0_64, %c0_65] : memref<4x32x64xf32, #tpu.memory_space<vmem>>, vector<1x32x64xf32>
    %85 = vector.shape_cast %84 : vector<1x32x64xf32> to vector<32x64xf32>
    %cst_66 = arith.constant dense<0.000000e+00> : vector<1x64xf32>
    %86 = tpu.matmul %83, %85, %cst_66 {dimension_numbers = #tpu.dot_dimension_numbers<[1], [0], [0], [1], [0, 0, 1, 1], [], []>} : vector<1x32xf32>, vector<32x64xf32>, vector<1x64xf32> -> vector<1x64xf32>
    %87 = arith.addf %82, %86 : vector<1x64xf32>
    %88 = vector.extract_strided_slice %73 {offsets = [3, 0], sizes = [1, 32], strides = [1, 1]} : vector<4x32xf32> to vector<1x32xf32>
    %c3_67 = arith.constant 3 : index
    %c0_68 = arith.constant 0 : index
    %c0_69 = arith.constant 0 : index
    %89 = vector.load %arg8[%c3_67, %c0_68, %c0_69] : memref<4x32x64xf32, #tpu.memory_space<vmem>>, vector<1x32x64xf32>
    %90 = vector.shape_cast %89 : vector<1x32x64xf32> to vector<32x64xf32>
    %cst_70 = arith.constant dense<0.000000e+00> : vector<1x64xf32>
    %91 = tpu.matmul %88, %90, %cst_70 {dimension_numbers = #tpu.dot_dimension_numbers<[1], [0], [0], [1], [0, 0, 1, 1], [], []>} : vector<1x32xf32>, vector<32x64xf32>, vector<1x64xf32> -> vector<1x64xf32>
    %92 = arith.addf %87, %91 : vector<1x64xf32>
    %c0_71 = arith.constant 0 : index
    %c0_72 = arith.constant 0 : index
    %93 = vector.load %arg9[%c0_71, %c0_72] : memref<1x64xf32, #tpu.memory_space<vmem>>, vector<1x64xf32>
    %94 = arith.addf %92, %93 : vector<1x64xf32>
    %c0_73 = arith.constant 0 : index
    %c0_74 = arith.constant 0 : index
    %c0_75 = arith.constant 0 : index
    %95 = vector.load %arg10[%c0_73, %c0_74, %c0_75] : memref<1x1x64xf32, #tpu.memory_space<vmem>>, vector<1x1x64xf32>
    %96 = vector.shape_cast %95 : vector<1x1x64xf32> to vector<1x64xf32>
    %97 = vector.shape_cast %94 : vector<1x64xf32> to vector<1x1x64xf32>
    tpu.vector_store %arg10[%c0_73, %c0_74, %c0_75], %97 {strides = array<i32>} : memref<1x1x64xf32, #tpu.memory_space<vmem>>, vector<1x1x64xf32>,
    return
  }
  func.func @transform_0(%arg0: i32) -> (i32, i32, i32) {
    %c0_i32 = arith.constant 0 : i32
    %c0_i32_0 = arith.constant 0 : i32
    %c0_i32_1 = arith.constant 0 : i32
    return %arg0, %c0_i32, %c0_i32_0 : i32, i32, i32
  }
  func.func @transform_1(%arg0: i32) -> (i32, i32, i32) {
    %c0_i32 = arith.constant 0 : i32
    %c0_i32_0 = arith.constant 0 : i32
    %c0_i32_1 = arith.constant 0 : i32
    %c0_i32_2 = arith.constant 0 : i32
    return %c0_i32, %c0_i32_0, %c0_i32_1 : i32, i32, i32
  }
  func.func @transform_2(%arg0: i32) -> (i32, i32) {
    %c0_i32 = arith.constant 0 : i32
    %c0_i32_0 = arith.constant 0 : i32
    %c0_i32_1 = arith.constant 0 : i32
    return %c0_i32, %c0_i32_0 : i32, i32
  }
  func.func @transform_3(%arg0: i32) -> (i32, i32, i32) {
    %c0_i32 = arith.constant 0 : i32
    %c0_i32_0 = arith.constant 0 : i32
    %c0_i32_1 = arith.constant 0 : i32
    %c0_i32_2 = arith.constant 0 : i32
    return %c0_i32, %c0_i32_0, %c0_i32_1 : i32, i32, i32
  }
  func.func @transform_4(%arg0: i32) -> (i32, i32) {
    %c0_i32 = arith.constant 0 : i32
    %c0_i32_0 = arith.constant 0 : i32
    %c0_i32_1 = arith.constant 0 : i32
    return %c0_i32, %c0_i32_0 : i32, i32
  }
  func.func @transform_5(%arg0: i32) -> (i32, i32, i32) {
    %c0_i32 = arith.constant 0 : i32
    %c0_i32_0 = arith.constant 0 : i32
    %c0_i32_1 = arith.constant 0 : i32
    %c0_i32_2 = arith.constant 0 : i32
    return %c0_i32, %c0_i32_0, %c0_i32_1 : i32, i32, i32
  }
  func.func @transform_6(%arg0: i32) -> (i32, i32) {
    %c0_i32 = arith.constant 0 : i32
    %c0_i32_0 = arith.constant 0 : i32
    %c0_i32_1 = arith.constant 0 : i32
    return %c0_i32, %c0_i32_0 : i32, i32
  }
  func.func @transform_7(%arg0: i32) -> (i32, i32, i32) {
    %c0_i32 = arith.constant 0 : i32
    %c0_i32_0 = arith.constant 0 : i32
    %c0_i32_1 = arith.constant 0 : i32
    %c0_i32_2 = arith.constant 0 : i32
    return %c0_i32, %c0_i32_0, %c0_i32_1 : i32, i32, i32
  }
  func.func @transform_8(%arg0: i32) -> (i32, i32) {
    %c0_i32 = arith.constant 0 : i32
    %c0_i32_0 = arith.constant 0 : i32
    %c0_i32_1 = arith.constant 0 : i32
    return %c0_i32, %c0_i32_0 : i32, i32
  }
  func.func @transform_9(%arg0: i32) -> (i32, i32, i32) {
    %c0_i32 = arith.constant 0 : i32
    %c0_i32_0 = arith.constant 0 : i32
    %c0_i32_1 = arith.constant 0 : i32
    return %arg0, %c0_i32, %c0_i32_0 : i32, i32, i32
  }
}

</mosaic_0001>

<bundles_post_ra>
// kernel: image_encoder_forward.1
= control target key start
LH: loop header
LB: loop body
LE: loop exit
PB: predicated region body
PF: predicated region fallthrough
CT: control target
= control target key end

     0   :  { %s2419_s30 = smov 0   ;;  %s2666_s0 = inlined_call_operand.vmem [shape: f32[2,256,4], index: 0, kind: input, shape index: {}]   ;;  %s2667_s1 = inlined_call_operand.vmem [shape: f32[4,4,8], index: 1, kind: input, shape index: {}]   ;;  %s2668_s2 = inlined_call_operand.vmem [shape: f32[1,8], index: 2, kind: input, shape index: {}]   ;;  %s2669_s3 = inlined_call_operand.vmem [shape: f32[4,8,16], index: 3, kind: input, shape index: {}]   ;;  %s2670_s4 = inlined_call_operand.vmem [shape: f32[1,16], index: 4, kind: input, shape index: {}]   ;;  %s2671_s5 = inlined_call_operand.vmem [shape: f32[4,16,32], index: 5, kind: input, shape index: {}]   ;;  %s2672_s6 = inlined_call_operand.vmem [shape: f32[1,32], index: 6, kind: input, shape index: {}]   ;;  %s2673_s7 = inlined_call_operand.vmem [shape: f32[4,32,64], index: 7, kind: input, shape index: {}]   ;;  %s2674_s8 = inlined_call_operand.vmem [shape: f32[1,64], index: 8, kind: input, shape index: {}]   ;;  %s2675_s9 = inlined_call_operand.vmem [shape: f32[2,1,64], index: 9, kind: output, shape index: {}]  }
   0x1 LB: > { %s1964_s10 = sadd.s32 4294967295, %s2364_s30   ;;  %p1968_p0 = scmp.ge.s32.totalorder %s2364_s30, 1  ;;  %s2364_s30 = sphi %s2419_s30, %s19_s30  }
   0x2   : > { %p287_p1 = scmp.lt.s32.totalorder %s2364_s30, 3 }
   0x4   : > { %p288_p2 = pnand %p1968_p0, %p287_p1 }
   0x5   : > { %v1971_v0 = vld [vmem:[%s2667_s1 + $0x4] sm:$0xf] (!%p288_p2)  ;;  %vm389_vm0 = vcmask (!%p288_p2), 1043456   ;;  %p321_p3 = scmp.lt.s32.totalorder (!%p288_p2), %s1964_s10, 1  ;;  %v361_v1 = vld [vmem:[%s2667_s1] sm:$0xf] (!%p288_p2) }
   0x6   : > { %291 = sbr.rel (%p288_p2) target bundleno = 1004 (0x3ec), region = 56  ;;  %2133 = vmatprep.subr.msk.mxu0 (!%p288_p2), %vm389_vm0, %v1971_v0  ;;  %vm364_vm1 = vcmask (!%p288_p2), 31744   ;;  %v1990_v5 = vld [vmem:[%s2667_s1 + $0x8] sm:$0xf] (!%p288_p2)  ;;  %v2000_v14 = vld [vmem:[%s2667_s1 + $0xc] sm:$0xf] (!%p288_p2) }
   0x7   : > { %2134 = vmatpush3.msk.msra.mxu0 (!%p288_p2), %vm389_vm0, %v1971_v0  ;;  %v2011_v36 = vld [vmem:[%s2669_s3 + $0x8] sm:$0xff] (!%p288_p2)  ;;  %v937_v37 = vld [vmem:[%s2669_s3] sm:$0xff] (!%p288_p2)  ;;  %vm940_vm2 = vcmask (!%p288_p2), 64512   ;;  %v2016_v51 = vld [vmem:[%s2669_s3 + $0x10] sm:$0xff] (!%p288_p2)  ;;  %vm2367_vm3 = vmmov (!%p288_p2), 0   ;;  %vm1291_vm4 = vcmask (!%p288_p2), 130048  }
   0x8   : > { %2147 = vmatprep.subr.msk.mxu0 (!%p288_p2), %vm389_vm0, %v361_v1  ;;  %2189 = vmatprep.subr.mxu1 (!%p288_p2), %v2011_v36  ;;  %v2010_v40 = vld [vmem:[%s2668_s2] ss:$0 sm:$0xff] (!%p288_p2)  ;;  %v2019_v58 = vld [vmem:[%s2669_s3 + $0x18] sm:$0xff] (!%p288_p2)  ;;  %vm1610_vm5 = vcmask (!%p288_p2), 261120   ;;  %vm1915_vm6 = vcmask (!%p288_p2), 516096  }
   0x9   : > { %2190 = vmatpush3.msra.mxu1 (!%p288_p2), %v2011_v36 }
   0xa   : > { %2194 = vmatprep.subr.mxu1 (!%p288_p2), %v937_v37 }
   0xd   : > { %s2677_s10 = smov (!%p321_p3, %s1964_s10), 1 }
   0xe   : > { %s2052_s15 = sshll.u32 %s2677_s10, 8  ;;  %s328_s13 = scalar_lea.vmem %s2675_s9, %s2677_s10 }
   0xf   : > { %s2442_s18 = scalar_lea.vmem %s2666_s0, %s2052_s15 }
  0x10   : > { %v337_v2 = vld [vmem:[%s2442_s18 + $0x40] sm:$0xff]  ;;  %v338_v3 = vld [vmem:[%s2442_s18 + $0x48] sm:$0xff]  ;;  %v339_v4 = vld [vmem:[%s2442_s18 + $0x50] sm:$0xff] }
  0x11   : > { %2135 = vmatprep.mubr.msk.f32.mxu0 %vm364_vm1, %v337_v2  ;;  %v340_v6 = vld [vmem:[%s2442_s18 + $0x58] sm:$0xff]  ;;  %v341_v7 = vld [vmem:[%s2442_s18 + $0x60] sm:$0xff]  ;;  %v342_v8 = vld [vmem:[%s2442_s18 + $0x68] sm:$0xff] }
  0x12   : > { %2136 = vmatmul.mubr.msk.f32.vlgmr.msra.gmra.mrb[0].mxu0 %vm364_vm1, %v338_v3  ;;  %v343_v9 = vld [vmem:[%s2442_s18 + $0x70] sm:$0xff]  ;;  %v344_v10 = vld [vmem:[%s2442_s18 + $0x78] sm:$0xff]  ;;  %v329_v11 = vld [vmem:[%s2442_s18] sm:$0xff] }
  0x13   : > { %2148 = vmatpush3.msk.msra.mxu0 %vm389_vm0, %v361_v1  ;;  %2138 = vmatprep.mubr.msk.f32.mxu0 %vm364_vm1, %v339_v4  ;;  %v330_v12 = vld [vmem:[%s2442_s18 + $0x8] sm:$0xff]  ;;  %v331_v13 = vld [vmem:[%s2442_s18 + $0x10] sm:$0xff]  ;;  %v332_v15 = vld [vmem:[%s2442_s18 + $0x18] sm:$0xff]  ;;  %v2366_v4 = vmov 0.0|0.0  }
  0x14   : > { %2161 = vmatprep.subr.msk.mxu0 %vm389_vm0, %v1990_v5  ;;  %v333_v16 = vld [vmem:[%s2442_s18 + $0x20] sm:$0xff]  ;;  %v334_v17 = vld [vmem:[%s2442_s18 + $0x28] sm:$0xff]  ;;  %v335_v18 = vld [vmem:[%s2442_s18 + $0x30] sm:$0xff] }
  0x15   : > { %v336_v19 = vld [vmem:[%s2442_s18 + $0x38] sm:$0xff]  ;;  %v345_v20 = vld [vmem:[%s2442_s18 + $0x80] sm:$0xff]  ;;  %v346_v21 = vld [vmem:[%s2442_s18 + $0x88] sm:$0xff] }
  0x16   : > { %2139 = vmatmul.mubr.msk.f32.gmra.mrb[2].mxu0 %vm364_vm1, %v340_v6  ;;  %v347_v22 = vld [vmem:[%s2442_s18 + $0x90] sm:$0xff]  ;;  %v348_v23 = vld [vmem:[%s2442_s18 + $0x98] sm:$0xff]  ;;  %v349_v24 = vld [vmem:[%s2442_s18 + $0xa0] sm:$0xff] }
  0x17   : > { %2141 = vmatprep.mubr.msk.f32.mxu0 %vm364_vm1, %v341_v7  ;;  %v350_v25 = vld [vmem:[%s2442_s18 + $0xa8] sm:$0xff]  ;;  %v351_v26 = vld [vmem:[%s2442_s18 + $0xb0] sm:$0xff]  ;;  %v352_v27 = vld [vmem:[%s2442_s18 + $0xb8] sm:$0xff] }
  0x18   : > { %v353_v28 = vld [vmem:[%s2442_s18 + $0xc0] sm:$0xff]  ;;  %v354_v29 = vld [vmem:[%s2442_s18 + $0xc8] sm:$0xff]  ;;  %v355_v30 = vld [vmem:[%s2442_s18 + $0xd0] sm:$0xff] }
  0x19   : > { %v356_v31 = vld [vmem:[%s2442_s18 + $0xd8] sm:$0xff]  ;;  %v357_v32 = vld [vmem:[%s2442_s18 + $0xe0] sm:$0xff]  ;;  %v358_v33 = vld [vmem:[%s2442_s18 + $0xe8] sm:$0xff] }
  0x1a   : > { %2142 = vmatmul.mubr.msk.f32.gmra.mrb[4].mxu0 %vm364_vm1, %v342_v8  ;;  %v359_v34 = vld [vmem:[%s2442_s18 + $0xf0] sm:$0xff]  ;;  %v360_v35 = vld [vmem:[%s2442_s18 + $0xf8] sm:$0xff]  ;;  %v2022_v6 = vld [vmem:[%s2670_s4] ss:$0 sm:$0xff] }
  0x1b   : > { %2144 = vmatprep.mubr.msk.f32.mxu0 %vm364_vm1, %v343_v9  ;;  %v2023_v1 = vld [vmem:[%s2671_s5 + $0x10] sm:$0xff]  ;;  %v2024_v2 = vld [vmem:[%s2671_s5 + $0x18] sm:$0xff] }
  0x1c   : > { %v2282_v3 = vpack.c.bf16 %v2024_v2, %v2023_v1 }
  0x1e   : > { %2145 = vmatmul.mubr.msk.f32.gmra.mrb[6].mxu0 %vm364_vm1, %v344_v10  ;;  %v1284_v10 = vld [vmem:[%s2671_s5] sm:$0xff] }
  0x1f   : > { %2149 = vmatprep.mubr.msk.f32.mxu0 %vm364_vm1, %v329_v11  ;;  %v1285_v11 = vld [vmem:[%s2671_s5 + $0x8] sm:$0xff] }
  0x22   : > { %2150 = vmatmul.mubr.msk.f32.vlgmr.msra.gmra.mrb[0].mxu0 %vm364_vm1, %v330_v12 }
  0x23   : > { %2162 = vmatpush3.msk.msra.mxu0 %vm389_vm0, %v1990_v5  ;;  %2152 = vmatprep.mubr.msk.f32.mxu0 %vm364_vm1, %v331_v13  ;;  %v2368_v5 = vmov 0.0   ;;  %v2285_v13 = vpack.c.bf16 %v1285_v11, %v1284_v10 }
  0x24   : > { %2175 = vmatprep.subr.msk.mxu0 %vm389_vm0, %v2000_v14 }
  0x26   : > { %2153 = vmatmul.mubr.msk.f32.gmra.mrb[2].mxu0 %vm364_vm1, %v332_v15  ;;  %v2027_v15 = vld [vmem:[%s2671_s5 + $0x20] sm:$0xff] }
  0x27   : > { %2155 = vmatprep.mubr.msk.f32.mxu0 %vm364_vm1, %v333_v16  ;;  %v2028_v16 = vld [vmem:[%s2671_s5 + $0x28] sm:$0xff] }
  0x2a   : > { %2156 = vmatmul.mubr.msk.f32.gmra.mrb[4].mxu0 %vm364_vm1, %v334_v17  ;;  %v2288_v17 = vpack.c.bf16 %v2028_v16, %v2027_v15 }
  0x2b   : > { %2158 = vmatprep.mubr.msk.f32.mxu0 %vm364_vm1, %v335_v18 }
  0x2e   : > { %2159 = vmatmul.mubr.msk.f32.gmra.mrb[6].mxu0 %vm364_vm1, %v336_v19  ;;  %v2030_v19 = vld [vmem:[%s2671_s5 + $0x30] sm:$0xff] }
  0x2f   : > { %2163 = vmatprep.mubr.msk.f32.mxu0 %vm364_vm1, %v345_v20  ;;  %v2031_v20 = vld [vmem:[%s2671_s5 + $0x38] sm:$0xff] }
  0x32   : > { %2164 = vmatmul.mubr.msk.f32.vlgmr.msra.gmra.mrb[0].mxu0 %vm364_vm1, %v346_v21  ;;  %v2291_v21 = vpack.c.bf16 %v2031_v20, %v2030_v19 }
  0x33   : > { %2176 = vmatpush3.msk.msra.mxu0 %vm389_vm0, %v2000_v14  ;;  %2166 = vmatprep.mubr.msk.f32.mxu0 %vm364_vm1, %v347_v22 }
  0x36   : > { %2167 = vmatmul.mubr.msk.f32.gmra.mrb[2].mxu0 %vm364_vm1, %v348_v23 }
  0x37   : > { %2169 = vmatprep.mubr.msk.f32.mxu0 %vm364_vm1, %v349_v24  ;;  %v2034_v24 = vld [vmem:[%s2673_s7 + $0x20] sm:$0xff] }
  0x3a   : > { %2170 = vmatmul.mubr.msk.f32.gmra.mrb[4].mxu0 %vm364_vm1, %v350_v25  ;;  %v2035_v25 = vld [vmem:[%s2673_s7 + $0x28] sm:$0xff] }
  0x3b   : > { %2172 = vmatprep.mubr.msk.f32.mxu0 %vm364_vm1, %v351_v26  ;;  %v2294_v26 = vpack.c.bf16 %v2035_v25, %v2034_v24 }
  0x3e   : > { %2173 = vmatmul.mubr.msk.f32.gmra.mrb[6].mxu0 %vm364_vm1, %v352_v27  ;;  %v2036_v27 = vld [vmem:[%s2673_s7 + $0x30] sm:$0xff] }
  0x3f   : > { %2177 = vmatprep.mubr.msk.f32.mxu0 %vm364_vm1, %v353_v28  ;;  %v2037_v28 = vld [vmem:[%s2673_s7 + $0x38] sm:$0xff] }
  0x42   : > { %2178 = vmatmul.mubr.msk.f32.vlgmr.msra.gmra.mrb[0].mxu0 %vm364_vm1, %v354_v29  ;;  %v2297_v29 = vpack.c.bf16 %v2037_v28, %v2036_v27 }
  0x43   : > { %2180 = vmatprep.mubr.msk.f32.mxu0 %vm364_vm1, %v355_v30 }
  0x46   : > { %2181 = vmatmul.mubr.msk.f32.gmra.mrb[2].mxu0 %vm364_vm1, %v356_v31 }
  0x47   : > { %2183 = vmatprep.mubr.msk.f32.mxu0 %vm364_vm1, %v357_v32 }
  0x4a   : > { %2184 = vmatmul.mubr.msk.f32.gmra.mrb[4].mxu0 %vm364_vm1, %v358_v33 }
  0x4b   : > { %2186 = vmatprep.mubr.msk.f32.mxu0 %vm364_vm1, %v359_v34 }
  0x4e   : > { %2187 = vmatmul.mubr.msk.f32.gmra.mrb[6].mxu0 %vm364_vm1, %v360_v35 }
 0x115   : > { %v2179_v38 = vpop.f32.mrb[0].mxu0 }
 0x116   : > { %v867_v39 = vpop.f32.mrb[1].mxu0  ;;  %v922_v53 = vadd.f32 %v2179_v38, %v2010_v40 }
 0x117   : > { %v921_v44 = vadd.f32 %v2010_v40, %v867_v39  ;;  %v2033_v39 = vld [vmem:[%s2672_s6] ss:$0 sm:$0xff] }
 0x118   : > { %v930_v56 = vmax.f32 %v922_v53, 0.0 }
 0x119   : > { %v2182_v41 = vpop.f32.mrb[2].mxu0  ;;  %v929_v50 = vmax.f32 %v921_v44, 0.0  ;;  %v1600_v44 = vld [vmem:[%s2673_s7 + $0x8] sm:$0xff] }
 0x11a   : > { %v924_v42 = vadd.f32 %v2182_v41, %v2010_v40  ;;  %v877_v43 = vpop.f32.mrb[3].mxu0 }
 0x11b   : > { %v923_v45 = vadd.f32 %v2010_v40, %v877_v43  ;;  %v1599_v43 = vld [vmem:[%s2673_s7] sm:$0xff] }
 0x11c   : > { %v932_v48 = vmax.f32 %v924_v42, 0.0 }
 0x11d   : > { %v931_v46 = vmax.f32 %v923_v45, 0.0  ;;  %v2185_v47 = vpop.f32.mrb[4].mxu0 }
 0x11e   : > { %v887_v49 = vpop.f32.mrb[5].mxu0  ;;  %v926_v59 = vadd.f32 %v2185_v47, %v2010_v40 }
 0x11f   : > { %2191 = vmatprep.mubr.msk.f32.mxu1 %vm940_vm2, %v931_v46  ;;  %v925_v55 = vadd.f32 %v2010_v40, %v887_v49  ;;  %v2300_v46 = vpack.c.bf16 %v1600_v44, %v1599_v43  ;;  %v1602_v49 = vld [vmem:[%s2673_s7 + $0x18] sm:$0xff] }
 0x120   : > { %2192 = vmatmul.mubr.msk.f32.vlgmr.msra.gmra.mrb[0].mxu1 %vm940_vm2, %v932_v48  ;;  %v934_v61 = vmax.f32 %v926_v59, 0.0  ;;  %v1601_v48 = vld [vmem:[%s2673_s7 + $0x10] sm:$0xff] }
 0x121   : > { %2195 = vmatpush3.msra.mxu1 %v937_v37  ;;  %v2188_v52 = vpop.f32.mrb[6].mxu0  ;;  %2196 = vmatprep.mubr.msk.f32.mxu1 %vm940_vm2, %v929_v50  ;;  %v933_v57 = vmax.f32 %v925_v55, 0.0  ;;  %v2303_v50 = vpack.c.bf16 %v1602_v49, %v1601_v48  ;;  %v2043_v55 = vld [vmem:[%s2673_s7 + $0x58] sm:$0xff] }
 0x122   : > { %v897_v54 = vpop.f32.mrb[7].mxu0  ;;  %2199 = vmatprep.subr.mxu1 %v2016_v51  ;;  %v928_v63 = vadd.f32 %v2188_v52, %v2010_v40  ;;  %v2041_v52 = vld [vmem:[%s2673_s7 + $0x48] sm:$0xff] }
 0x123   : > { %v927_v60 = vadd.f32 %v2010_v40, %v897_v54  ;;  %v2042_v54 = vld [vmem:[%s2673_s7 + $0x50] sm:$0xff] }
 0x124   : > { %v936_v0 = vmax.f32 %v928_v63, 0.0 }
 0x125   : > { %v935_v62 = vmax.f32 %v927_v60, 0.0 }
 0x128   : > { %2197 = vmatmul.mubr.msk.f32.vlgmr.msra.gmra.mrb[0].mxu1 %vm940_vm2, %v930_v56  ;;  %v2309_v56 = vpack.c.bf16 %v2043_v55, %v2042_v54 }
 0x129   : > { %2200 = vmatpush3.msra.mxu1 %v2016_v51  ;;  %2201 = vmatprep.mubr.msk.f32.mxu1 %vm940_vm2, %v933_v57  ;;  %v2040_v51 = vld [vmem:[%s2673_s7 + $0x40] sm:$0xff] }
 0x12a   : > { %2204 = vmatprep.subr.mxu1 %v2019_v58  ;;  %v2306_v53 = vpack.c.bf16 %v2041_v52, %v2040_v51  ;;  %v2045_v57 = vld [vmem:[%s2673_s7 + $0x60] sm:$0xff] }
 0x130   : > { %2202 = vmatmul.mubr.msk.f32.vlgmr.msra.gmra.mrb[0].mxu1 %vm940_vm2, %v934_v61  ;;  %v2047_v61 = vld [vmem:[%s2673_s7 + $0x70] sm:$0xff] }
 0x131   : > { %2205 = vmatpush3.msra.mxu1 %v2019_v58  ;;  %2206 = vmatprep.mubr.msk.f32.mxu1 %vm940_vm2, %v935_v62  ;;  %v2046_v58 = vld [vmem:[%s2673_s7 + $0x68] sm:$0xff]  ;;  %v2048_v62 = vld [vmem:[%s2673_s7 + $0x78] sm:$0xff] }
 0x132   : > { %2281 = vmatprep.subr.bf16.mxu1 %v2366_v4  ;;  %v2312_v59 = vpack.c.bf16 %v2046_v58, %v2045_v57  ;;  %v2315_v63 = vpack.c.bf16 %v2048_v62, %v2047_v61 }
 0x138   : > { %2207 = vmatmul.mubr.msk.f32.vlgmr.msra.gmra.mrb[0].mxu1 %vm940_vm2, %v936_v0 }
 0x139   : > { %2283 = vmatpush3.bf16.msra.mxu1 %v2282_v3  ;;  %2213 = vmatprep.mubr.msk.f32.mxu1 %vm2367_vm3, %v2368_v5 }
 0x13a   : > { %2284 = vmatprep.subr.bf16.mxu1 %v2366_v4 }
 0x20b   : > { %v2208_v7 = vpop.f32.mrb[0].mxu1 }
 0x20c   : > { %v1262_v8 = vpop.f32.mrb[1].mxu1  ;;  %v1281_v18 = vadd.f32 %v2208_v7, %v2022_v6 }
 0x20d   : > { %v1280_v9 = vadd.f32 %v2022_v6, %v1262_v8 }
 0x20e   : > { %v1283_v22 = vmax.f32 %v1281_v18, 0.0 }
 0x20f   : > { %v1282_v12 = vmax.f32 %v1280_v9, 0.0 }
 0x210   : > { %v1516_v23 = vrot.slane %v1283_v22, 4 }
 0x211   : > { %v1290_v14 = vrot.slane %v1282_v12, 4 }
 0x213   : > { %2214 = vmatmul.mubr.msk.f32.vlgmr.msra.gmra.mrb[2].mxu1 %vm1291_vm4, %v1290_v14 }
 0x214   : > { %2286 = vmatpush3.bf16.msra.mxu1 %v2285_v13  ;;  %2220 = vmatprep.mubr.msk.f32.mxu1 %vm2367_vm3, %v2368_v5 }
 0x215   : > { %2287 = vmatprep.subr.bf16.mxu1 %v2366_v4 }
 0x217   : > { %2221 = vmatmul.mubr.msk.f32.vlgmr.msra.gmra.mrb[4].mxu1 %vm1291_vm4, %v1282_v12 }
 0x218   : > { %2289 = vmatpush3.bf16.msra.mxu1 %v2288_v17  ;;  %2227 = vmatprep.mubr.msk.f32.mxu1 %vm2367_vm3, %v2368_v5 }
 0x219   : > { %2290 = vmatprep.subr.bf16.mxu1 %v2366_v4 }
 0x21b   : > { %2228 = vmatmul.mubr.msk.f32.vlgmr.msra.gmra.mrb[6].mxu1 %vm1291_vm4, %v1283_v22 }
 0x21c   : > { %2292 = vmatpush3.bf16.msra.mxu1 %v2291_v21  ;;  %2234 = vmatprep.mubr.msk.f32.mxu1 %vm2367_vm3, %v2368_v5 }
 0x21d   : > { %2293 = vmatprep.subr.bf16.mxu1 %v2366_v4 }
 0x21f   : > { %2235 = vmatmul.mubr.msk.f32.vlgmr.msra.gmra.mrb[8].mxu1 %vm1291_vm4, %v1516_v23 }
 0x220   : > { %2245 = vmatprep.mubr.msk.f32.mxu1 %vm2367_vm3, %v2368_v5  ;;  %2295 = vmatpush3.bf16.msra.mxu1 %v2294_v26 }
 0x221   : > { %2296 = vmatprep.subr.bf16.mxu1 %v2366_v4 }
 0x224   : > { %2298 = vmatpush3.bf16.msra.mxu1 %v2297_v29 }
 0x225   : > { %2299 = vmatprep.subr.bf16.mxu1 %v2366_v4 }
 0x2e6   : > { %v1360_v30 = vpop.f32.mrb[2].mxu1 }
 0x2e7   : > { %v2215_v31 = vpop.f32.mrb[3].mxu1 }
 0x2ea   : > { %v1432_v32 = vpop.f32.mrb[4].mxu1 }
 0x2eb   : > { %v1433_v33 = vadd.f32 %v1432_v32, %v1360_v30  ;;  %v2222_v34 = vpop.f32.mrb[5].mxu1 }
 0x2ee   : > { %v1508_v35 = vpop.f32.mrb[6].mxu1 }
 0x2ef   : > { %v1512_v36 = vadd.f32 %v1508_v35, %v1433_v33  ;;  %v2229_v37 = vpop.f32.mrb[7].mxu1 }
 0x2f2   : > { %v1585_v38 = vpop.f32.mrb[8].mxu1 }
 0x2f3   : > { %v1589_v40 = vadd.f32 %v1585_v38, %v1512_v36  ;;  %v2236_v41 = vpop.f32.mrb[9].mxu1 }
 0x2f5   : > { %v1597_v42 = vadd.f32 %v2033_v39, %v1589_v40 }
 0x2f7   : > { %v1598_v45 = vmax.f32 %v1597_v42, 0.0 }
 0x2f9   : > { %v1609_v47 = vrot.slane %v1598_v45, 1  ;;  %v1760_v60 = vrot.slane %v1598_v45, 2  ;;  %v1839_v0 = vrot.slane %v1598_v45, 3 }
 0x2fb   : > { %2246 = vmatmul.mubr.msk.f32.vlgmr.msra.gmra.mrb[10].mxu1 %vm1610_vm5, %v1609_v47 }
 0x2fc   : > { %2301 = vmatpush3.bf16.msra.mxu1 %v2300_v46  ;;  %2256 = vmatprep.mubr.msk.f32.mxu1 %vm2367_vm3, %v2368_v5 }
 0x2fd   : > { %2302 = vmatprep.subr.bf16.mxu1 %v2366_v4 }
 0x300   : > { %2304 = vmatpush3.bf16.msra.mxu1 %v2303_v50 }
 0x301   : > { %2305 = vmatprep.subr.bf16.mxu1 %v2366_v4 }
 0x303   : > { %2257 = vmatmul.mubr.msk.f32.vlgmr.msra.gmra.mrb[12].mxu1 %vm1610_vm5, %v1598_v45 }
 0x304   : > { %2307 = vmatpush3.bf16.msra.mxu1 %v2306_v53  ;;  %2267 = vmatprep.mubr.msk.f32.mxu1 %vm2367_vm3, %v2368_v5 }
 0x305   : > { %2308 = vmatprep.subr.bf16.mxu1 %v2366_v4 }
 0x308   : > { %2310 = vmatpush3.bf16.msra.mxu1 %v2309_v56 }
 0x309   : > { %2311 = vmatprep.subr.bf16.mxu1 %v2366_v4 }
 0x30b   : > { %2268 = vmatmul.mubr.msk.f32.vlgmr.msra.gmra.mrb[14].mxu1 %vm1610_vm5, %v1760_v60 }
 0x30c   : > { %2313 = vmatpush3.bf16.msra.mxu1 %v2312_v59  ;;  %2278 = vmatprep.mubr.msk.f32.mxu1 %vm2367_vm3, %v2368_v5  ;;  %v1913_v5 = vld [vmem:[%s2674_s8] sm:$0x1] }
 0x30d   : > { %2314 = vmatprep.subr.bf16.mxu1 %v2366_v4 }
 0x310   : > { %2316 = vmatpush3.bf16.msra.mxu1 %v2315_v63 }
 0x313   : > { %2279 = vmatmul.mubr.msk.f32.vlgmr.msra.gmra.mrb[16].mxu1 %vm1610_vm5, %v1839_v0 }
 0x3ce   : > { %v1679_v1 = vpop.f32.mrb[10].mxu1 }
 0x3cf   : > { %v2247_v2 = vpop.f32.mrb[11].mxu1 }
 0x3d6   : > { %v1751_v3 = vpop.f32.mrb[12].mxu1 }
 0x3d7   : > { %v1752_v6 = vadd.f32 %v1751_v3, %v1679_v1  ;;  %v2258_v7 = vpop.f32.mrb[13].mxu1 }
 0x3de   : > { %v1829_v8 = vpop.f32.mrb[14].mxu1 }
 0x3df   : > { %v1833_v9 = vadd.f32 %v1829_v8, %v1752_v6  ;;  %v2269_v10 = vpop.f32.mrb[15].mxu1 }
 0x3e6   : > { %v1908_v11 = vpop.f32.mrb[16].mxu1 }
 0x3e7   : > { %v1912_v12 = vadd.f32 %v1908_v11, %v1833_v9  ;;  %v2280_v4 = vpop.f32.mrb[17].mxu1 }
 0x3e9   : > { %v1914_v13 = vadd.f32 %v1913_v5, %v1912_v12 }
 0x3eb   : > { %1916 = vst.msk [vmem:[%s328_s13] sm:$0x1] %vm1915_vm6, %v1914_v13 }
 0x3ec PF: > { %s19_s30 = sadd.s32 1, %s2364_s30  }
 0x3ed   : > { %p16_p4 = scmp.ge.s32.totalorder %s19_s30, 4  }
 0x3ef   :  { %18 = sbr.rel (!%p16_p4) target bundleno = 1 (0x1), region = 98 }

</bundles_post_ra>
